<compile_context>
chip_gen: v7x
topology: tpu7x:2x2x1
jax: 0.10.0
libtpu: 0.0.40
codegen_flags: <defaults>
</compile_context>

<pallas_src>
import functools

import jax
import jax.numpy as jnp
import numpy as np
from jax.experimental import pallas as pl
from jax.experimental.pallas import tpu as pltpu

_MAX_TM = 2048           # row-tile cap (v5e/v6e feedback); VMEM budget clamps further
_MAX_SINGLE_K = 2048     # padded K above this -> K-split accumulator fallback
_RESIDENT_W_BYTES = 8 << 20


def _cdiv(a, b):
    return (a + b - 1) // b


def _round_up(a, m):
    return ((a + m - 1) // m) * m


def _align_down(a, m):
    return max(m, (a // m) * m)


def _vmem_capacity_bytes():
    try:
        info = pltpu.get_tpu_info()
        cap = getattr(info, "vmem_capacity_bytes", None)
        if cap:
            return int(cap)
    except Exception:
        pass
    return 64 << 20      # conservative fallback: v7x per-TensorCore VMEM


# --------------------------------------------------------------------------
# Kernels
# --------------------------------------------------------------------------
def _sine_kernel_single_k(x_ref, w_ref, b_ref, o_ref, *, compute_dtype):
    """Fused y = sin(x @ w + b); full K per tile -> no accumulator scratch."""
    x = x_ref[...].astype(compute_dtype)            # cast in-kernel (no host x copy)
    acc = jnp.dot(x, w_ref[...], preferred_element_type=jnp.float32)
    o_ref[...] = jnp.sin(acc + b_ref[...]).astype(o_ref.dtype)


def _sine_kernel_multi_k(x_ref, w_ref, b_ref, o_ref, acc_ref, *, compute_dtype):
    """Rare fallback when K is split across the grid (K_pad > _MAX_SINGLE_K)."""
    k = pl.program_id(2)

    @pl.when(k == 0)
    def _():
        acc_ref[...] = jnp.zeros_like(acc_ref)

    acc_ref[...] += jnp.dot(x_ref[...].astype(compute_dtype), w_ref[...],
                            preferred_element_type=jnp.float32)

    @pl.when(k == pl.num_programs(2) - 1)
    def _():
        o_ref[...] = jnp.sin(acc_ref[...] + b_ref[...]).astype(o_ref.dtype)


# --------------------------------------------------------------------------
# Tile planning
# --------------------------------------------------------------------------
def _plan_tiles(M, K_pad, N, x_bytes, in_bytes, out_bytes):
    cap = _vmem_capacity_bytes()
    budget = int(cap * 0.6)              # ~38 MiB on v7x (64 MiB), ~76 MiB on v5e/v6e

    n128 = _round_up(N, 128)             # lane-dense output tiles
    if 2 * K_pad * n128 * in_bytes <= _RESIDENT_W_BYTES:
        tn, N_pad = n128, n128           # whole weight + bias VMEM-resident
    else:
        tn = 1024
        N_pad = _round_up(N, tn)
    grid_n = N_pad // tn

    w_bytes = 2 * K_pad * tn * in_bytes + 2 * tn * 4          # (double-buffered) w + b
    per_row = 2 * K_pad * x_bytes + 2 * tn * out_bytes        # double-buffered x + out
    tm_budget = max(budget - w_bytes, per_row) // per_row

    if M < 8:
        tm = M                            # block second-minor == full array dim: allowed
    else:
        tm = int(min(tm_budget, _MAX_TM, M))
        tm = _align_down(tm, 16 if tm >= 16 else 8)
        # v7x megacore: guarantee >= 2 (i, j) tiles whenever M allows it.
        if grid_n == 1 and _cdiv(M, tm) == 1 and M >= 16:
            tm = _round_up(_cdiv(M, 2), 8)
    return tm, tn, N_pad, grid_n, cap


# --------------------------------------------------------------------------
# Public wrapper
# --------------------------------------------------------------------------
@functools.partial(jax.jit, static_argnames=("use_bf16", "out_dtype"))
def sine_layer(x, w_t, b, *, use_bf16=True, out_dtype=None):
    """SIREN SineLayer forward: sin(x @ w_t + b).

    x:   (..., K) activations (streamed in their native dtype, cast in-kernel)
    w_t: (K, N) = linear.weight.T      b: (N,)
    use_bf16:  run the MXU in bf16 with f32 accumulation (recommended for
               hidden layers; use False for the first layer / raw coordinates).
    out_dtype: output dtype (default: x.dtype).  Pass jnp.bfloat16 when the
               result feeds another bf16 layer to halve the HBM writeback.
    """
    *lead, K = x.shape
    Kw, N = w_t.shape
    if K != Kw:
        raise ValueError("in_features mismatch")
    x2 = x.reshape(-1, K)
    M = x2.shape[0]

    out_dtype = x.dtype if out_dtype is None else jnp.dtype(out_dtype)
    compute_dtype = jnp.bfloat16 if use_bf16 else jnp.float32
    in_bytes = jnp.dtype(compute_dtype).itemsize
    x_bytes = jnp.dtype(x2.dtype).itemsize
    out_bytes = jnp.dtype(out_dtype).itemsize

    # K alignment: 16 for bf16 sublane packing, 8 for f32.  For SIREN hidden
    # layers K is already aligned, so x is NOT copied; only the tiny-K first
    # layer pads x's (tiny) K axis with zeros.
    K_pad = _round_up(K, 16 if use_bf16 else 8)
    tm, tn, N_pad, grid_n, cap = _plan_tiles(M, K_pad, N, x_bytes, in_bytes, out_bytes)
    grid_m = _cdiv(M, tm)

    if K_pad != K:
        x2 = jnp.pad(x2, ((0, 0), (0, K_pad - K)))
    w_p = w_t
    if (K_pad != K) or (N_pad != N):
        w_p = jnp.pad(w_t, ((0, K_pad - K), (0, N_pad - N)))
    w_p = w_p.astype(compute_dtype)
    b_p = b if N_pad == N else jnp.pad(b, (0, N_pad - N))
    b_p = b_p.astype(jnp.float32).reshape(1, N_pad)

    if K_pad <= _MAX_SINGLE_K:
        # ---- fast path: single K tile, no accumulator scratch ----
        kernel = functools.partial(_sine_kernel_single_k, compute_dtype=compute_dtype)
        grid = (grid_m, grid_n)
        in_specs = [
            pl.BlockSpec((tm, K_pad), lambda i, j: (i, 0)),        # x: streamed
            pl.BlockSpec((K_pad, tn), lambda i, j: (0, j)),        # w: resident (grid_n==1)
            pl.BlockSpec((1, tn), lambda i, j: (0, j)),            # b: resident
        ]
        out_specs = pl.BlockSpec((tm, tn), lambda i, j: (i, j))
        scratch = ()
        semantics = ("parallel", "parallel")
        vmem_needed = (2 * tm * K_pad * x_bytes + 2 * K_pad * tn * in_bytes
                       + 2 * tn * 4 + 2 * tm * tn * out_bytes)
    else:
        # ---- rare fallback: split K, f32 accumulator resident across k ----
        # TODO(synk): consider pipeline_mode=pl.Buffered(3) on x/w if profiles
        #             show exposed DMA in this path.
        tk = 512
        K_full = _round_up(K_pad, tk)
        if K_full != K_pad:
            x2 = jnp.pad(x2, ((0, 0), (0, K_full - K_pad)))
            w_p = jnp.pad(w_p, ((0, K_full - K_pad), (0, 0)))
        K_pad = K_full
        kernel = functools.partial(_sine_kernel_multi_k, compute_dtype=compute_dtype)
        grid = (grid_m, grid_n, K_pad // tk)
        in_specs = [
            pl.BlockSpec((tm, tk), lambda i, j, k: (i, k)),
            pl.BlockSpec((tk, tn), lambda i, j, k: (k, j)),
            pl.BlockSpec((1, tn), lambda i, j, k: (0, j)),
        ]
        out_specs = pl.BlockSpec((tm, tn), lambda i, j, k: (i, j))
        scratch = (pltpu.VMEM((tm, tn), jnp.float32),)
        semantics = ("parallel", "parallel", "arbitrary")
        vmem_needed = (2 * tm * tk * x_bytes + 2 * tk * tn * in_bytes
                       + 2 * tn * 4 + 2 * tm * tn * out_bytes + tm * tn * 4)

    vmem_limit = min(int(cap * 0.9), max(16 << 20, vmem_needed + (8 << 20)))

    out = pl.pallas_call(
        kernel,
        out_shape=jax.ShapeDtypeStruct((M, N_pad), out_dtype),
        grid_spec=pltpu.PrefetchScalarGridSpec(
            num_scalar_prefetch=0,
            grid=grid,
            in_specs=in_specs,
            out_specs=out_specs,
            scratch_shapes=scratch,
        ),
        compiler_params=pltpu.CompilerParams(
            dimension_semantics=semantics,
            vmem_limit_bytes=vmem_limit,
        ),
    )(x2, w_p, b_p)

    if N_pad != N:
        out = out[:, :N]
    return out.reshape(*lead, N)


# --------------------------------------------------------------------------
# Host-side helpers (parameter prep, matching the PyTorch module)
# --------------------------------------------------------------------------
def init_sine_layer_params(key, in_features, out_features,
                           is_first=False, omega_0=30.0):
    """SIREN init matching SineLayer.init_weights (bias=True, bias zeroed)."""
    if is_first:
        bound = (1.0 / in_features) * omega_0
    else:
        bound = float(np.sqrt(3.0 / in_features))
    # PyTorch nn.Linear weight is (out, in); kernel takes the transpose.
    w = jax.random.uniform(key, (out_features, in_features),
                           dtype=jnp.float32, minval=-bound, maxval=bound)
    return w.T, jnp.zeros((out_features,), dtype=jnp.float32)


def fold_weight_norm(g, v):
    """Fold torch weight_norm (weight = g * v / ||v||_row, dim=0) into a plain
    transposed weight for sine_layer.  g: (out,), v: (out, in) -> (in, out)."""
    norm = jnp.sqrt(jnp.sum(v * v, axis=1, keepdims=True))
    return (g.reshape(-1, 1) * v / norm).T


# --------------------------------------------------------------------------
# Demo / self-test
# --------------------------------------------------------------------------
if __name__ == "__main__":
    key = jax.random.PRNGKey(0)
    k_x, k_w, k_x2, k_w2, k_x3, k_w3 = jax.random.split(key, 6)

    # --- Test 1: hidden SIREN layer, bf16 MXU path, f32 output --------------
    batch, fin, fout = 16, 32, 128
    x = jax.random.normal(k_x, (batch, fin), dtype=jnp.float32)
    w_t, b = init_sine_layer_params(k_w, fin, fout, is_first=False)
    y = jax.block_until_ready(sine_layer(x, w_t, b))
    y_ref = jnp.sin(jnp.dot(x.astype(jnp.bfloat16), w_t.astype(jnp.bfloat16),
                            preferred_element_type=jnp.float32) + b)
    np.testing.assert_allclose(np.asarray(y), np.asarray(y_ref),
                               rtol=1e-3, atol=1e-3)

    # --- Test 2: first SIREN layer (tiny K, ragged M and N), f32 path -------
    b2m, fin2, fout2 = 13, 3, 96
    x2 = jax.random.uniform(k_x2, (b2m, fin2), dtype=jnp.float32,
                            minval=-1.0, maxval=1.0)
    w2_t, b2 = init_sine_layer_params(k_w2, fin2, fout2, is_first=True,
                                      omega_0=30.0)
    y2 = jax.block_until_ready(sine_layer(x2, w2_t, b2, use_bf16=False))
    ref2 = np.sin(np.asarray(x2, np.float64) @ np.asarray(w2_t, np.float64)
                  + np.asarray(b2, np.float64))
    np.testing.assert_allclose(np.asarray(y2, np.float64), ref2,
                               rtol=0, atol=5e-4)

    # --- Test 3: bf16 output path (feeds the next bf16 layer), ragged M -----
    b3m, fin3, fout3 = 300, 64, 256
    x3 = jax.random.normal(k_x3, (b3m, fin3), dtype=jnp.float32)
    w3_t, b3 = init_sine_layer_params(k_w3, fin3, fout3, is_first=False)
    y3 = jax.block_until_ready(sine_layer(x3, w3_t, b3, out_dtype=jnp.bfloat16))
    assert y3.dtype == jnp.bfloat16 and y3.shape == (b3m, fout3)
    ref3 = np.sin(np.asarray(x3, np.float64) @ np.asarray(w3_t, np.float64)
                  + np.asarray(b3, np.float64))
    np.testing.assert_allclose(np.asarray(y3, np.float64), ref3,
                               rtol=0, atol=3e-2)

    print("KERNEL_OK")
</pallas_src>

<mosaic_0001>
module attributes {stable_mosaic.version = 11 : i64} {
  func.func @_sine_kernel_single_k(%arg0: i32, %arg1: i32, %arg2: memref<8x32xf32, #tpu.memory_space<vmem>>, %arg3: memref<32x128xbf16, #tpu.memory_space<vmem>>, %arg4: memref<1x128xf32, #tpu.memory_space<vmem>>, %arg5: memref<8x128xf32, #tpu.memory_space<vmem>>) attributes {dimension_semantics = [#tpu.dimension_semantics<parallel>, #tpu.dimension_semantics<parallel>], iteration_bounds = array<i64: 2, 1>, scalar_prefetch = 0 : i64, scratch_operands = 0 : i64, tpu.core_type = #tpu.core_type<tc>, window_params = [{transform_indices = @transform_0, window_bounds = array<i64: 8, 32>}, {transform_indices = @transform_1, window_bounds = array<i64: 32, 128>}, {transform_indices = @transform_2, window_bounds = array<i64: 1, 128>}, {transform_indices = @transform_3, window_bounds = array<i64: 8, 128>}]} {
    %c0 = arith.constant 0 : index
    %c0_0 = arith.constant 0 : index
    %0 = vector.load %arg2[%c0, %c0_0] : memref<8x32xf32, #tpu.memory_space<vmem>>, vector<8x32xf32>
    %1 = arith.truncf %0 : vector<8x32xf32> to vector<8x32xbf16>
    %c0_1 = arith.constant 0 : index
    %c0_2 = arith.constant 0 : index
    %2 = vector.load %arg3[%c0_1, %c0_2] : memref<32x128xbf16, #tpu.memory_space<vmem>>, vector<32x128xbf16>
    %cst = arith.constant dense<0.000000e+00> : vector<8x128xf32>
    %3 = tpu.matmul %1, %2, %cst {dimension_numbers = #tpu.dot_dimension_numbers<[1], [0], [0], [1], [0, 0, 1, 1], [], []>} : vector<8x32xbf16>, vector<32x128xbf16>, vector<8x128xf32> -> vector<8x128xf32>
    %c0_3 = arith.constant 0 : index
    %c0_4 = arith.constant 0 : index
    %4 = vector.load %arg4[%c0_3, %c0_4] : memref<1x128xf32, #tpu.memory_space<vmem>>, vector<1x128xf32>
    %5 = vector.broadcast %4 : vector<1x128xf32> to vector<8x128xf32>
    %6 = arith.addf %3, %5 : vector<8x128xf32>
    %7 = math.sin %6 : vector<8x128xf32>
    %c0_5 = arith.constant 0 : index
    %c0_6 = arith.constant 0 : index
    %8 = vector.load %arg5[%c0_5, %c0_6] : memref<8x128xf32, #tpu.memory_space<vmem>>, vector<8x128xf32>
    tpu.vector_store %arg5[%c0_5, %c0_6], %7 {strides = array<i32>} : memref<8x128xf32, #tpu.memory_space<vmem>>, vector<8x128xf32>,
    return
  }
  func.func @transform_0(%arg0: i32, %arg1: i32) -> (i32, i32) {
    %c0_i32 = arith.constant 0 : i32
    %c0_i32_0 = arith.constant 0 : i32
    return %arg0, %c0_i32 : i32, i32
  }
  func.func @transform_1(%arg0: i32, %arg1: i32) -> (i32, i32) {
    %c0_i32 = arith.constant 0 : i32
    %c0_i32_0 = arith.constant 0 : i32
    return %c0_i32, %arg1 : i32, i32
  }
  func.func @transform_2(%arg0: i32, %arg1: i32) -> (i32, i32) {
    %c0_i32 = arith.constant 0 : i32
    %c0_i32_0 = arith.constant 0 : i32
    return %c0_i32, %arg1 : i32, i32
  }
  func.func @transform_3(%arg0: i32, %arg1: i32) -> (i32, i32) {
    %c0_i32 = arith.constant 0 : i32
    return %arg0, %arg1 : i32, i32
  }
}

</mosaic_0001>

<bundles_post_ra>
// kernel: sine_layer.1
= control target key start
LH: loop header
LB: loop body
LE: loop exit
PB: predicated region body
PF: predicated region fallthrough
CT: control target
= control target key end

     0   :  { %8 = vsyncpa [#allocation3], 0  ;;  %s852_s0 = inlined_call_operand.vmem [shape: f32[16,32], index: 0, kind: input, shape index: {}]   ;;  %s853_s1 = inlined_call_operand.vmem [shape: bf16[32,128], index: 1, kind: input, shape index: {}]   ;;  %s854_s2 = inlined_call_operand.vmem [shape: f32[1,128], index: 2, kind: input, shape index: {}]   ;;  %s855_s3 = inlined_call_operand.hbm [shape: f32[16,128], index: 3, kind: output, shape index: {}]  }
   0x1   :  { %10 = vsyncpa [#allocation3 + $0x1], 0  ;;  %s710_s12 = smov 0   ;;  %s712_s13 = smov 0  }
   0x2   :  { %s714_s14 = smov 0   ;;  %s716_s15 = smov 0  }
   0x3   :  { %s718_s16 = smov 0   ;;  %s720_s17 = smov 0  }
   0x4 LB: > { %s496_s18 = sadd.s32 4294967295, %s679_s17   ;;  %s497_s19 = sadd.s32 4294967294, %s679_s17   ;;  %s679_s17 = sphi %s720_s17, %s16_s17   ;;  %s675_s16 = sphi %s718_s16, %s862_s16   ;;  %s671_s15 = sphi %s716_s15, %s861_s15   ;;  %s667_s14 = sphi %s714_s14, %s860_s14   ;;  %s663_s13 = sphi %s712_s13, %s859_s13   ;;  %s659_s12 = sphi %s710_s12, %s858_s12  }
   0x5   : > { %s28_s20 = sadd.s32 1, %s675_s16  ;;  %s115_s21 = sadd.s32 1, %s667_s14 }
   0x6   : > { %p30_p0 = scmp.ge.s32.totalorder %s28_s20, 2  ;;  %p125_p1 = scmp.ne.s32.totalorder %s667_s14, %s663_s13 }
   0x7   : > { %p126_p2 = scmp.eq.s32.totalorder %s496_s18, 1  ;;  %p131_p3 = scmp.ne.s32.totalorder %s663_s13, %s659_s12 }
   0x8   : > { %s864_s20 = smov (%p30_p0, %s28_s20), 0  ;;  %p132_p5 = scmp.eq.s32.totalorder %s497_s19, 1 }
   0x9   : > { %p750_p4 = por %p126_p2, %p125_p1  ;;  %s110_s23 = ssub.s32 %s675_s16, %s864_s20 }
   0xa   : > { %p502_p6 = scmp.ge.s32.totalorder %s679_s17, 1  ;;  %p113_p7 = scmp.eq.s32.totalorder %s110_s23, 0 }
   0xb   : > { %p757_p8 = por %p132_p5, %p131_p3  ;;  %p170_p9 = scmp.lt.s32.totalorder %s679_s17, 3 }
   0xc   : > { %s763_s25 = scalar_select %p113_p7, %s667_s14, %s115_s21  }
   0xd   : > { %p171_p10 = pnand %p502_p6, %p170_p9 }
   0xe   : > { %v595_v0 = vld [vmem:[%s853_s1] sm:$0xff] (!%p171_p10)   ;;  %v681_v1 = vmov (!%p171_p10), 0.0   ;;  %v596_v2 = vld [vmem:[%s853_s1 + $0x8] sm:$0xff] (!%p171_p10)   ;;  %vm682_vm0 = vmmov (!%p171_p10), 0   ;;  %p200_p11 = scmp.lt.s32.totalorder (!%p171_p10), %s671_s15, 1  ;;  %vm237_vm1 = vcmask (!%p171_p10), 261120  }
   0xf   : > { %174 = sbr.rel (%p171_p10) target bundleno = 336 (0x150), region = 32  ;;  %520 = vmatprep.subr.bf16.mxu0 (!%p171_p10), %v681_v1  ;;  %524 = vmatprep.mubr.msk.bf16.mxu0 (!%p171_p10), %vm682_vm0, %v681_v1  ;;  %v505_v5 = vld [vmem:[%s854_s2] ss:$0 sm:$0xff] (!%p171_p10)  ;;  %v683_v21 = vmov (!%p171_p10), 683565275   ;;  %s197_s10 = sand.u32 (!%p171_p10), 1, %s663_s13  }
  0x10   : > { %521 = vmatpush3.bf16.msra.mxu0 (!%p171_p10), %v595_v0  ;;  %v684_v23 = vmov (!%p171_p10), 2475754826   ;;  %v685_v26 = vmov (!%p171_p10), 2131351028   ;;  %v686_v29 = vmov (!%p171_p10), 2102212464  }
  0x11   : > { %522 = vmatprep.subr.bf16.mxu0 (!%p171_p10), %v681_v1  ;;  %v687_v32 = vmov (!%p171_p10), 920167782   ;;  %v688_v35 = vmov (!%p171_p10), 1326507024   ;;  %s503_s11 = sshll.u32 (!%p171_p10), %s197_s10, 3  ;;  %s514_s18 = sshll.u32 (!%p171_p10), %s671_s15, 7 }
  0x12   : > { %s199_s19 = scalar_lea.vmem (!%p171_p10), [#allocation2], %s503_s11  ;;  %s805_s27 = scalar_lea.hbm (!%p171_p10), %s855_s3, %s514_s18 }
  0x13   : > { %s401_s21 = sshll.u32 (!%p171_p10), %s199_s19, 4  ;;  %s689_s29 = smov (!%p171_p10), [#allocation2]   ;;  %s807_s21 = int_to_ptr.vmem [resolvable:$true] %s401_s21 }
  0x14   : > { %523 = vmatpush3.bf16.msra.mxu0 (!%p171_p10), %v596_v2  ;;  %s601_s28 = scalar_lea.vmem (!%p171_p10), %s807_s21, 128 }
  0x15   : > { %p602_p12 = scmp.ne.s32.totalorder (!%p171_p10), %s807_s21, %s601_s28 }
  0x16   : > { %s201_s30 = scalar_select %p200_p11, %s671_s15, 1 }
  0x17   : > { %s387_s15 = scalar_lea.sflag [#allocation3], %s197_s10  ;;  %p603_p13 = pnand %p602_p12, %p750_p4 }
  0x18   : > { %s504_s4 = sshll.u32 %s201_s30, 3  ;;  %s605_s30 = sshll.u32 %s689_s29, 4  ;;  %s606_s30 = int_to_ptr.vmem [resolvable:$false] %s605_s30 }
  0x19   : > { %s203_s7 = scalar_lea.vmem %s852_s0, %s504_s4  ;;  %p604_p0 = pneg %p603_p13 }
  0x1a   : > { %v212_v3 = vld [vmem:[%s203_s7] sm:$0xff]  ;;  %s607_s4 = scalar_lea.vmem %s606_s30, 256  ;;  %p608_p1 = scmp.lt.s32.totalorder %s807_s21, %s606_s30 }
  0x1b   : > { %v213_v4 = vpack.c.bf16 %v212_v3, %v212_v3  ;;  %p609_p2 = scmp.lt.s32.totalorder %s607_s4, %s601_s28 }
  0x1d   : > { %525 = vmatmul.mubr.msk.bf16.vlgmr.msra.gmra.mrb[0].mxu0 %vm237_vm1, %v213_v4  ;;  %p610_p3 = por %p609_p2, %p608_p1 }
  0x1f   : > { %p611_p5 = pnand %p610_p3, %p604_p0 }
  0xf0   : > { %v275_v6 = vpop.f32.mrb[0].mxu0 }
  0xf1   : > { %v779_v7 = vadd.f32 %v505_v5, %v275_v6  ;;  %v526_v8 = vpop.f32.mrb[1].mxu0 }
  0xf2   : > { %v278_v9 = vpop.f32.mrb[2].mxu0 }
  0xf3   : > { %v284_v10 = vand.u32 2139095040, %v779_v7  ;;  %v527_v11 = vpop.f32.mrb[3].mxu0  ;;  %v281_v15 = vand.u32 2147483647, %v779_v7  ;;  %vm283_vm9 = vcmp.lt.s32.totalorder %v779_v7, 0  ;;  %vm373_vm14 = vweird.f32 %v779_v7 }
  0xf5   : > { %v285_v12 = vshrl.u32 %v284_v10, 23  ;;  %v288_v18 = vand.u32 8388607, %v281_v15  ;;  %vm282_vm10 = vcmp.le.f32.partialorder %v281_v15, 0.7853982 }
  0xf7   : > { %v509_v13 = vadd.s32 4294967169, %v285_v12  ;;  %v289_v37 = vor.u32 8388608, %v288_v18 }
  0xf9   : > { %v291_v14 = vadd.s32 1, %v509_v13  ;;  %v329_v51 = vshll.u32 %v289_v37, 8 }
  0xfb   : > { %vm292_vm2 = vcmp.gt.s32.totalorder %v291_v14, 0 }
  0xfc   : > { %v293_v16 = vsel %vm292_vm2, %v291_v14, 0 }
  0xfd   : > { %v295_v17 = vand.u32 31, %v293_v16  ;;  %v294_v20 = vshrl.u32 %v293_v16, 5 }
  0xff   : > { %v296_v19 = vsub.s32 32, %v295_v17  ;;  %v298_v22 = vshll.u32 %v683_v21, %v295_v17  ;;  %v301_v24 = vshll.u32 %v684_v23, %v295_v17  ;;  %v304_v28 = vshll.u32 %v685_v26, %v295_v17 }
 0x100   : > { %v307_v31 = vshll.u32 %v686_v29, %v295_v17  ;;  %v310_v34 = vshll.u32 %v687_v32, %v295_v17  ;;  %vm313_vm3 = vcmp.lt.s32.totalorder %v294_v20, 1  ;;  %vm316_vm4 = vcmp.lt.s32.totalorder %v294_v20, 4 }
 0x101   : > { %v299_v25 = vshrl.u32 %v684_v23, %v296_v19  ;;  %v302_v27 = vshrl.u32 %v685_v26, %v296_v19  ;;  %v305_v30 = vshrl.u32 %v686_v29, %v296_v19  ;;  %v308_v33 = vshrl.u32 %v687_v32, %v296_v19 }
 0x102   : > { %v311_v36 = vshrl.u32 %v688_v35, %v296_v19  ;;  %v297_v46 = vshrl.u32 %v683_v21, %v296_v19  ;;  %vm315_vm5 = vcmp.lt.s32.totalorder %v294_v20, 3  ;;  %vm314_vm6 = vcmp.lt.s32.totalorder %v294_v20, 2 }
 0x103   : > { %v300_v38 = vor.u32 %v299_v25, %v298_v22  ;;  %v303_v39 = vor.u32 %v302_v27, %v301_v24  ;;  %v306_v40 = vor.u32 %v305_v30, %v304_v28  ;;  %v309_v41 = vor.u32 %v308_v33, %v307_v31 }
 0x104   : > { %v312_v42 = vor.u32 %v311_v36, %v310_v34 }
 0x105   : > { %v318_v43 = vsel %vm316_vm4, %v306_v40, 2102212464  ;;  %v321_v44 = vsel %vm313_vm3, %v300_v38, %v303_v39  ;;  %v325_v45 = vsel %vm313_vm3, %v303_v39, %v306_v40  ;;  %v322_v47 = vsel %vm316_vm4, %v309_v41, 920167782 }
 0x106   : > { %v326_v48 = vsel %vm316_vm4, %v312_v42, 1326507024  ;;  %v323_v49 = vsel %vm315_vm5, %v306_v40, %v322_v47  ;;  %v317_v52 = vsel %vm313_vm3, %v297_v46, %v300_v38  ;;  %v319_v53 = vsel %vm315_vm5, %v303_v39, %v318_v43 }
 0x107   : > { %v327_v50 = vsel %vm315_vm5, %v309_v41, %v326_v48  ;;  %v324_v54 = vsel %vm314_vm6, %v321_v44, %v323_v49  ;;  %v320_v60 = vsel %vm314_vm6, %v317_v52, %v319_v53 }
 0x108   : > { %v328_v55 = vsel %vm314_vm6, %v325_v45, %v327_v50  ;;  %v788_v58 = vmul.u32.u64.low %v329_v51, %v324_v54  ;;  %v789_v59 = vmul.u32.u64.high %v329_v51, %v324_v54, %v788_v58  ;;  %v336_v62 = vmul.u32 %v329_v51, %v320_v60 }
 0x109   : > { %v785_v56 = vmul.u32.u64.low %v329_v51, %v328_v55  ;;  %v786_v57 = vmul.u32.u64.high %v329_v51, %v328_v55, %v785_v56 }
 0x10a   : > { %v339_v61 = vadd.s32 1, %v789_v59 }
 0x10b   : > { %vm338_vm7 = vc.u32 %v786_v57, %v788_v58  ;;  %v337_v11 = vadd.s32 %v788_v58, %v786_v57 }
 0x10c   : > { %v340_v63 = vsel %vm338_vm7, %v339_v61, %v789_v59 }
 0x10d   : > { %v341_v0 = vadd.s32 %v340_v63, %v336_v62 }
 0x10f   : > { %v342_v1 = vadd.s32 536870912, %v341_v0 }
 0x111   : > { %v343_v2 = vshrl.u32 %v342_v1, 30 }
 0x113   : > { %v344_v3 = vshll.u32 %v343_v2, 30  ;;  %v367_v24 = vsub.s32 4, %v343_v2 }
 0x115   : > { %v345_v4 = vsub.s32 %v341_v0, %v344_v3  ;;  %v368_v27 = vsel %vm283_vm9, %v367_v24, %v343_v2 }
 0x116   : > { %v370_v29 = vsel %vm282_vm10, 0, %v368_v27 }
 0x117   : > { %v347_v5 = vsub.s32 0, %v345_v4  ;;  %v374_v30 = vadd.s32 3, %v370_v29 }
 0x119   : > { %v510_v6 = vmin.u32 %v347_v5, %v345_v4  ;;  %v375_v31 = vand.u32 3, %v374_v30 }
 0x11b   : > { %v349_v8 = vclz %v510_v6  ;;  %vm380_vm11 = vcmp.eq.s32.totalorder %v375_v31, 2  ;;  %vm377_vm12 = vcmp.eq.s32.totalorder %v375_v31, 0  ;;  %vm376_vm13 = vcmp.lt.s32.totalorder %v375_v31, 2 }
 0x11d   : > { %v511_v9 = vadd.s32 4294967294, %v349_v8 }
 0x11f   : > { %vm512_vm8 = vcmp.lt.s32.totalorder %v511_v9, 0 }
 0x120   : > { %v352_v10 = vsel %vm512_vm8, 0, %v511_v9 }
 0x121   : > { %v353_v12 = vsub.s32 32, %v352_v10  ;;  %v357_v13 = vsub.s32 4294967266, %v352_v10  ;;  %v354_v14 = vshll.u32 %v345_v4, %v352_v10 }
 0x123   : > { %v355_v16 = vshrl.u32 %v337_v11, %v353_v12  ;;  %v358_v17 = vadd.s32 127, %v357_v13 }
 0x125   : > { %v356_v18 = vor.u32 %v355_v16, %v354_v14  ;;  %v359_v19 = vshll.u32 %v358_v17, 23 }
 0x127   : > { %v360_v20 = vor.u32 4788187, %v359_v19  ;;  %v363_v22 = vcvt.s32.f32 %v356_v18 }
 0x129   : > { %v361_v21 = vand.u32 2147483647, %v360_v20 }
 0x12b   : > { %v364_v23 = vmul.f32 %v363_v22, %v361_v21 }
 0x12d   : > { %v365_v25 = vxor.u32 2147483648, %v364_v23 }
 0x12f   : > { %v366_v26 = vsel %vm283_vm9, %v365_v25, %v364_v23 }
 0x130   : > { %v369_v28 = vsel %vm282_vm10, %v779_v7, %v366_v26 }
 0x131   : > { %597 = vcosq.f32 %v369_v28 }
 0x132   : > { %599 = vsinq.f32 %v369_v28 }
 0x13b   : > { %v598_v32 = vpop.eup %597 }
 0x13c   : > { %v600_v33 = vpop.eup %599  ;;  %v381_v34 = vxor.u32 2147483648, %v598_v32 }
 0x13d   : > { %v378_v35 = vxor.u32 2147483648, %v600_v33 }
 0x13e   : > { %v382_v15 = vsel %vm380_vm11, %v381_v34, %v600_v33 }
 0x13f   : > { %v379_v36 = vsel %vm377_vm12, %v598_v32, %v378_v35 }
 0x140   : > { %v383_v37 = vsel %vm376_vm13, %v379_v36, %v382_v15 }
 0x141   : > { %v384_v38 = vsel %vm373_vm14, nan, %v383_v37 }
 0x142   : > { %385 = vst [vmem:[%s199_s19] sm:$0xff] %v384_v38 }
 0x143   : > { %614 = shalt.err (!%p611_p5)
}
 0x144   : > { %s615_s5 = scalar_lea.hbm %s805_s27, 128  ;;  %s619_s8 = scalar_lea.hbm %s855_s3, 256 }
 0x145   : > { %p616_p6 = scmp.ne.s32.totalorder %s805_s27, %s615_s5  ;;  %p620_p10 = scmp.lt.u32.totalorder %s805_s27, %s855_s3 }
 0x146   : > { %p621_p11 = scmp.lt.u32.totalorder %s619_s8, %s615_s5  ;;  %p623_p13 = scmp.lt.u32.totalorder %s615_s5, %s805_s27 }
 0x147   : > { %p617_p7 = pnand %p616_p6, %p750_p4 }
 0x148   : > { %p622_p12 = por %p621_p11, %p620_p10 }
 0x149   : > { %p618_p9 = pneg %p617_p7 }
 0x14a   : > { %p624_p0 = por %p623_p13, %p622_p12 }
 0x14c   : > { %p625_p1 = pnand %p624_p0, %p618_p9 }
 0x14e   : > { %628 = shalt.err (!%p625_p1)
}
 0x14f   : > { %532 = dma.vmem_to_hbm [thread:$0]  (%p750_p4), %s807_s21, 128, %s805_s27, %s387_s15  }
 0x150 PF: > { %p538_p2 = scmp.ge.s32.totalorder %s679_s17, 2  ;;  %s413_s11 = sand.u32 1, %s659_s12  }
 0x151   : > { %s414_s18 = scalar_lea.sflag [#allocation3], %s413_s11 }
 0x152   : > { %p535_p3 = pnand %p538_p2, %p757_p8 }
 0x154   : > { %654 = dma.done.wait (!%p535_p3), %s414_s18, 128  }
 0x155   : > { %656 = vsyncadd (!%p535_p3), %s414_s18, 4294967168  ;;  %s16_s17 = sadd.s32 1, %s679_s17   ;;  %s858_s12 = smov %s663_s13 }
 0x156   : > { %p13_p5 = scmp.ge.s32.totalorder %s16_s17, 4   ;;  %s859_s13 = smov %s667_s14 }
 0x157   : > { %s860_s14 = smov %s763_s25  ;;  %s861_s15 = smov %s675_s16 }
 0x158   : > { %s862_s16 = smov %s864_s20  ;;  %15 = sbr.rel (!%p13_p5) target bundleno = 4 (0x4), region = 73 }
 0x15f   :  { %419 = vsyncpa [#allocation3], 1 }
 0x160   :  { %421 = vsyncpa [#allocation3 + $0x1], 1 }

</bundles_post_ra>
